<compile_context>
chip_gen: v7x
topology: tpu7x:2x2x1
jax: 0.10.0
libtpu: 0.0.40
codegen_flags: <defaults>
</compile_context>

<pallas_src>
import functools
import math

import jax
import jax.numpy as jnp
from jax.experimental import pallas as pl
from jax.experimental.pallas import tpu as pltpu


def _vmem_budget_bytes():
    """Generation-aware scoped-VMEM budget for the accumulation pass."""
    try:
        phys = pltpu.get_tpu_info().vmem_capacity_bytes
    except Exception:
        phys = 64 << 20  # be conservative if the query is unavailable
    if phys >= (100 << 20):
        # v5e / v6e: 128 MiB physical -> raise well past the default scoped cap.
        return 100 << 20
    # v7x-class: 64 MiB physical; leave headroom for internal scratch.
    return min(52 << 20, max(phys - (12 << 20), 16 << 20))


def _choose_tiling(n, f_out_pad, n_blocks, a_itemsize, budget_bytes):
    """Pick (tm, tk, xw_resident) for the pass-1 grid.

    Constraints: tm | n with tm % 16 == 0 (or tm == n); tk | n with
    tk % 128 == 0 (or tk == n).  Preference order: largest tm (amortize the
    per-step overhead) but capped at n // 2 so the parallel row axis feeds both
    v7x TensorCores, then largest tk, then a VMEM-resident XW when it fits.
    """
    tm_cands = [t for t in (1024, 512, 256, 128, 64, 32, 16) if n % t == 0]
    if not tm_cands:
        # TODO(synk): awkward N (no multiple-of-8 divisor) falls back to a full
        # row stripe; padding N would cost an extra HBM pass over A.
        tm_cands = [8] if n % 8 == 0 else [n]
    halved = [t for t in tm_cands if t <= n // 2]
    if halved:
        tm_cands = halved

    if n % 128 == 0:
        tk_cands = []
        for t in (n, 4096, 2048, 1024, 512, 256, 128):
            if t <= n and n % t == 0 and t not in tk_cands:
                tk_cands.append(t)
    else:
        tk_cands = [n]  # lane dim must be a multiple of 128 or full-extent

    stats_bytes = 2 * 8 * f_out_pad * 4
    xw_resident_bytes = 2 * n_blocks * n * f_out_pad * 2  # bf16, buffer-count safe

    def fits(tm, tk, resident):
        a_bytes = 2 * tm * tk * a_itemsize               # double-buffered A tile
        y_bytes = 2 * tm * f_out_pad * 4                  # resident f32 accumulator
        xw_bytes = xw_resident_bytes if resident else 2 * tk * f_out_pad * 2
        return a_bytes + y_bytes + xw_bytes + stats_bytes <= budget_bytes

    for resident in (True, False):
        for tm in tm_cands:
            for tk in tk_cands:
                if fits(tm, tk, resident):
                    return tm, tk, resident
    return tm_cands[-1], tk_cands[-1], False


def _krylov_accum_kernel(a_ref, xw_ref, y_ref, stats_ref, *, xw_resident):
    """Grid = (row_tiles, n_blocks, k_tiles).

    Per step: y_tile += bf16(A_exp[b] tile) @ XW[b] tile, accumulated in f32
    directly in the VMEM-resident, lane-dense output block.  On the last
    reduction step, per-row-tile column sums / sums of squares are emitted for
    the global standardization pass.
    """
    b = pl.program_id(1)
    k = pl.program_id(2)
    nb = pl.num_programs(1)
    nk = pl.num_programs(2)

    @pl.when(jnp.logical_and(b == 0, k == 0))
    def _():
        y_ref[...] = jnp.zeros_like(y_ref)

    # Stream A at its native dtype; cast the tile to bf16 in VMEM (VPU) so the
    # MXU runs its fast bf16 path.  No separate HBM cast pass over A.
    a_tile = a_ref[...].astype(jnp.bfloat16)
    if xw_resident:
        xw_tile = xw_ref[b * nk + k]     # XW resident in VMEM, fetched once
    else:
        xw_tile = xw_ref[...]            # streamed (tk, F_out_pad) block
    y_ref[...] += jnp.dot(a_tile, xw_tile, preferred_element_type=jnp.float32)

    @pl.when(jnp.logical_and(b == nb - 1, k == nk - 1))
    def _():
        y = y_ref[...]
        # Direct slice stores (no concatenate / sublane relayout).
        stats_ref[0:1, 0:1, :] = jnp.sum(y, axis=0, keepdims=True)[None]
        stats_ref[0:1, 1:2, :] = jnp.sum(y * y, axis=0, keepdims=True)[None]


def _normalize_kernel(scale_ref, shift_ref, y_ref, o_ref):
    """out = y * inv_std + (bias - mean * inv_std), per lane-dense row tile."""
    o_ref[...] = (y_ref[...] * scale_ref[...] + shift_ref[...]).astype(o_ref.dtype)


@jax.jit
def truncated_krylov_forward(a_exp, x, w, bias):
    n_blocks, n, _ = a_exp.shape
    f_in = x.shape[1]
    f_out = w.shape[1]

    # Lane-dense padding of the output feature dim (unmasked stores, full vreg
    # lanes in the accumulator); padded columns are sliced off at the end.
    f_out_pad = max(128, ((f_out + 127) // 128) * 128)
    pad = f_out_pad - f_out
    w_pad = jnp.pad(w.astype(jnp.float32), ((0, 0), (0, pad)))
    bias_pad = jnp.pad(bias.astype(jnp.float32), (0, pad)).reshape(1, f_out_pad)

    # Fuse the two per-block matmuls: concat_i(A_i @ X) @ W == sum_i A_i @ (X @ W_i).
    # X @ W_i is tiny and computed once, so the kernel contraction is K = N.
    w_blocks = w_pad.reshape(n_blocks, f_in, f_out_pad)
    xw = jnp.einsum("nf,bfo->bno", x.astype(jnp.float32), w_blocks)

    budget = _vmem_budget_bytes()
    tm, tk, xw_resident = _choose_tiling(
        n, f_out_pad, n_blocks, a_exp.dtype.itemsize, budget - (6 << 20))
    num_tiles = max(n // tm, 1)
    num_k = max(n // tk, 1)

    # One (tk, F_out_pad) bf16 slab per (block, K-tile): kernel-side selection
    # is a single dynamic first-axis index.
    xw_flat = xw.reshape(n_blocks, num_k, tk, f_out_pad) \
                .reshape(n_blocks * num_k, tk, f_out_pad).astype(jnp.bfloat16)

    if xw_resident:
        xw_spec = pl.BlockSpec((n_blocks * num_k, tk, f_out_pad),
                               lambda r, b, k: (0, 0, 0))       # resident, 1 fetch
    else:
        xw_spec = pl.BlockSpec((pl.Squeezed(), tk, f_out_pad),
                               lambda r, b, k: (b * num_k + k, 0, 0))

    # Pass 1: Krylov accumulation + per-row-tile column stats.
    y, stats = pl.pallas_call(
        functools.partial(_krylov_accum_kernel, xw_resident=xw_resident),
        out_shape=(
            jax.ShapeDtypeStruct((n, f_out_pad), jnp.float32),
            jax.ShapeDtypeStruct((num_tiles, 2, f_out_pad), jnp.float32),
        ),
        grid_spec=pltpu.PrefetchScalarGridSpec(
            num_scalar_prefetch=0,
            grid=(num_tiles, n_blocks, num_k),    # rows parallel, reductions last
            in_specs=[
                pl.BlockSpec((pl.Squeezed(), tm, tk),
                             lambda r, b, k: (b, r, k)),         # A tile, native dtype
                xw_spec,
            ],
            out_specs=(
                pl.BlockSpec((tm, f_out_pad), lambda r, b, k: (r, 0)),       # y accum
                pl.BlockSpec((1, 2, f_out_pad), lambda r, b, k: (r, 0, 0)),  # tile stats
            ),
        ),
        compiler_params=pltpu.CompilerParams(
            dimension_semantics=("parallel", "arbitrary", "arbitrary"),
            vmem_limit_bytes=int(budget),
        ),
    )(a_exp, xw_flat)

    # Global standardization constants (tiny), hoisted out of the per-row-tile
    # normalize pass.  torch.Tensor.std default is unbiased (ddof=1); n == 1
    # yields NaN exactly like torch.  Single-pass variance can round slightly
    # negative for near-constant columns -> clamp before rsqrt.
    colsum = jnp.sum(stats[:, 0, :], axis=0)
    colsq = jnp.sum(stats[:, 1, :], axis=0)
    mean = colsum / float(n)
    var = (colsq - float(n) * mean * mean) / float(n - 1)
    var = jnp.maximum(var, 0.0)
    inv_std = jax.lax.rsqrt(var)                       # EUP rsqrt, not a VALU divide
    scale = inv_std.reshape(1, f_out_pad)
    shift = bias_pad - mean.reshape(1, f_out_pad) * scale

    # Pass 2: fused scale/shift (standardize + bias), tiled and parallel over rows.
    out_pad = pl.pallas_call(
        _normalize_kernel,
        out_shape=jax.ShapeDtypeStruct((n, f_out_pad), jnp.float32),
        grid_spec=pltpu.PrefetchScalarGridSpec(
            num_scalar_prefetch=0,
            grid=(num_tiles,),
            in_specs=[
                pl.BlockSpec((1, f_out_pad), lambda r: (0, 0)),      # scale (resident)
                pl.BlockSpec((1, f_out_pad), lambda r: (0, 0)),      # shift (resident)
                pl.BlockSpec((tm, f_out_pad), lambda r: (r, 0)),     # y row tile
            ],
            out_specs=pl.BlockSpec((tm, f_out_pad), lambda r: (r, 0)),
        ),
        compiler_params=pltpu.CompilerParams(
            dimension_semantics=("parallel",),
        ),
    )(scale, shift, y)

    return out_pad[:, :f_out]


def reference_forward(a_exp, x, w, bias):
    """Pure-JAX f32 reference mirroring the PyTorch forward (LIST_A_EXP path, eye=True)."""
    feats = [a_exp[i] @ x for i in range(a_exp.shape[0])]
    out = jnp.concatenate(feats, axis=1) @ w
    mean = out.mean(axis=0)
    std = out.std(axis=0, ddof=1)   # torch default unbiased std
    out = (out - mean) / std
    return out + bias


if __name__ == "__main__":
    key = jax.random.PRNGKey(0)
    k_a, k_x, k_w, k_b = jax.random.split(key, 4)

    # Small shapes consistent with the module: graph with N nodes, F_in input
    # features, n_blocks Krylov blocks, F_out output features.
    N, F_IN, N_BLOCKS, F_OUT = 64, 16, 3, 32

    a_exp = jax.random.normal(k_a, (N_BLOCKS, N, N), dtype=jnp.float32) / math.sqrt(N)
    x = jax.random.normal(k_x, (N, F_IN), dtype=jnp.float32)

    # Parameter init matching reset_parameters(): U(-1/sqrt(out_features), +...)
    stdv = 1.0 / math.sqrt(F_OUT)
    w = jax.random.uniform(k_w, (F_IN * N_BLOCKS, F_OUT),
                           minval=-stdv, maxval=stdv, dtype=jnp.float32)
    bias = jax.random.uniform(k_b, (F_OUT,),
                              minval=-stdv, maxval=stdv, dtype=jnp.float32)

    out = truncated_krylov_forward(a_exp, x, w, bias)
    out = jax.block_until_ready(out)

    ref = reference_forward(a_exp, x, w, bias)
    assert out.shape == (N, F_OUT)
    # Tolerance vs. the pure-f32 reference: the matmul operands are reduced to
    # bf16 on the MXU (f32 accumulation); output is standardized so values are O(1).
    max_err = float(jnp.max(jnp.abs(out - ref)))
    assert jnp.allclose(out, ref, atol=5e-2, rtol=5e-2), f"max abs err = {max_err}"
    assert not bool(jnp.any(jnp.isnan(out)))

    # TODO(synk): the eye=False branch (adj @ output + bias), the sparse
    # torch.spmm path, and a cached int8 (v5e/v6e) / fp8 (v7x) quantized-A
    # stream (quantization must live outside the jitted forward to pay off)
    # are not implemented; dense adjacency powers cover the math.
    print("KERNEL_OK")
</pallas_src>

<mosaic_0001>
module attributes {stable_mosaic.version = 11 : i64} {
  func.func @_krylov_accum_kernel(%arg0: i32, %arg1: i32, %arg2: i32, %arg3: memref<1x32x64xf32, #tpu.memory_space<vmem>>, %arg4: memref<3x64x128xbf16, #tpu.memory_space<vmem>>, %arg5: memref<32x128xf32, #tpu.memory_space<vmem>>, %arg6: memref<1x2x128xf32, #tpu.memory_space<vmem>>) attributes {dimension_semantics = [#tpu.dimension_semantics<parallel>, #tpu.dimension_semantics<arbitrary>, #tpu.dimension_semantics<arbitrary>], iteration_bounds = array<i64: 2, 3, 1>, scalar_prefetch = 0 : i64, scratch_operands = 0 : i64, tpu.core_type = #tpu.core_type<tc>, window_params = [{transform_indices = @transform_0, window_bounds = array<i64: 1, 32, 64>}, {pipeline_mode = #tpu.pipeline_mode<synchronous>, transform_indices = @transform_1, window_bounds = array<i64: 3, 64, 128>}, {transform_indices = @transform_2, window_bounds = array<i64: 32, 128>}, {transform_indices = @transform_3, window_bounds = array<i64: 1, 2, 128>}]} {
    %c0_i32 = arith.constant 0 : i32
    %0 = arith.cmpi eq, %arg1, %c0_i32 : i32
    %c0_i32_0 = arith.constant 0 : i32
    %1 = arith.cmpi eq, %arg2, %c0_i32_0 : i32
    %2 = arith.andi %0, %1 : i1
    %3 = arith.extui %2 : i1 to i32
    %c0_i32_1 = arith.constant 0 : i32
    %4 = arith.cmpi ne, %3, %c0_i32_1 : i32
    scf.if %4 {
      %cst_12 = arith.constant 0.000000e+00 : f32
      %22 = vector.broadcast %cst_12 : f32 to vector<32x128xf32>
      %c0_13 = arith.constant 0 : index
      %c0_14 = arith.constant 0 : index
      %23 = vector.load %arg5[%c0_13, %c0_14] : memref<32x128xf32, #tpu.memory_space<vmem>>, vector<32x128xf32>
      tpu.vector_store %arg5[%c0_13, %c0_14], %22 {strides = array<i32>} : memref<32x128xf32, #tpu.memory_space<vmem>>, vector<32x128xf32>,
    } else {
    }
    %c0 = arith.constant 0 : index
    %c0_2 = arith.constant 0 : index
    %c0_3 = arith.constant 0 : index
    %5 = vector.load %arg3[%c0, %c0_2, %c0_3] : memref<1x32x64xf32, #tpu.memory_space<vmem>>, vector<1x32x64xf32>
    %6 = vector.shape_cast %5 : vector<1x32x64xf32> to vector<32x64xf32>
    %7 = arith.truncf %6 : vector<32x64xf32> to vector<32x64xbf16>
    %c1_i32 = arith.constant 1 : i32
    %8 = arith.muli %arg1, %c1_i32 : i32
    %9 = arith.addi %8, %arg2 : i32
    %10 = arith.index_cast %9 : i32 to index
    %c0_4 = arith.constant 0 : index
    %c0_5 = arith.constant 0 : index
    %11 = vector.load %arg4[%10, %c0_4, %c0_5] : memref<3x64x128xbf16, #tpu.memory_space<vmem>>, vector<1x64x128xbf16>
    %12 = vector.shape_cast %11 : vector<1x64x128xbf16> to vector<64x128xbf16>
    %c0_6 = arith.constant 0 : index
    %c0_7 = arith.constant 0 : index
    %13 = vector.load %arg5[%c0_6, %c0_7] : memref<32x128xf32, #tpu.memory_space<vmem>>, vector<32x128xf32>
    %cst = arith.constant dense<0.000000e+00> : vector<32x128xf32>
    %14 = tpu.matmul %7, %12, %cst {dimension_numbers = #tpu.dot_dimension_numbers<[1], [0], [0], [1], [0, 0, 1, 1], [], []>} : vector<32x64xbf16>, vector<64x128xbf16>, vector<32x128xf32> -> vector<32x128xf32>
    %15 = arith.addf %13, %14 : vector<32x128xf32>
    %c0_8 = arith.constant 0 : index
    %c0_9 = arith.constant 0 : index
    %16 = vector.load %arg5[%c0_8, %c0_9] : memref<32x128xf32, #tpu.memory_space<vmem>>, vector<32x128xf32>
    tpu.vector_store %arg5[%c0_8, %c0_9], %15 {strides = array<i32>} : memref<32x128xf32, #tpu.memory_space<vmem>>, vector<32x128xf32>,
    %c2_i32 = arith.constant 2 : i32
    %17 = arith.cmpi eq, %arg1, %c2_i32 : i32
    %c0_i32_10 = arith.constant 0 : i32
    %18 = arith.cmpi eq, %arg2, %c0_i32_10 : i32
    %19 = arith.andi %17, %18 : i1
    %20 = arith.extui %19 : i1 to i32
    %c0_i32_11 = arith.constant 0 : i32
    %21 = arith.cmpi ne, %20, %c0_i32_11 : i32
    scf.if %21 {
      %c0_12 = arith.constant 0 : index
      %c0_13 = arith.constant 0 : index
      %22 = vector.load %arg5[%c0_12, %c0_13] : memref<32x128xf32, #tpu.memory_space<vmem>>, vector<32x128xf32>
      %cst_14 = arith.constant dense<0.000000e+00> : vector<128xf32>
      %23 = vector.multi_reduction <add>, %22, %cst_14 [0] : vector<32x128xf32> to vector<128xf32>
      %24 = vector.shape_cast %23 : vector<128xf32> to vector<1x128xf32>
      %25 = vector.shape_cast %24 : vector<1x128xf32> to vector<1x1x128xf32>
      %c0_15 = arith.constant 0 : index
      %c0_16 = arith.constant 0 : index
      %c0_17 = arith.constant 0 : index
      %26 = vector.load %arg6[%c0_15, %c0_16, %c0_17] : memref<1x2x128xf32, #tpu.memory_space<vmem>>, vector<1x1x128xf32>
      tpu.vector_store %arg6[%c0_15, %c0_16, %c0_17], %25 {strides = array<i32>} : memref<1x2x128xf32, #tpu.memory_space<vmem>>, vector<1x1x128xf32>,
      %27 = arith.mulf %22, %22 : vector<32x128xf32>
      %cst_18 = arith.constant dense<0.000000e+00> : vector<128xf32>
      %28 = vector.multi_reduction <add>, %27, %cst_18 [0] : vector<32x128xf32> to vector<128xf32>
      %29 = vector.shape_cast %28 : vector<128xf32> to vector<1x128xf32>
      %30 = vector.shape_cast %29 : vector<1x128xf32> to vector<1x1x128xf32>
      %c0_19 = arith.constant 0 : index
      %c1 = arith.constant 1 : index
      %c0_20 = arith.constant 0 : index
      %31 = vector.load %arg6[%c0_19, %c1, %c0_20] : memref<1x2x128xf32, #tpu.memory_space<vmem>>, vector<1x1x128xf32>
      tpu.vector_store %arg6[%c0_19, %c1, %c0_20], %30 {strides = array<i32>} : memref<1x2x128xf32, #tpu.memory_space<vmem>>, vector<1x1x128xf32>,
    } else {
    }
    return
  }
  func.func @transform_0(%arg0: i32, %arg1: i32, %arg2: i32) -> (i32, i32, i32) {
    %c0_i32 = arith.constant 0 : i32
    return %arg1, %arg0, %arg2 : i32, i32, i32
  }
  func.func @transform_1(%arg0: i32, %arg1: i32, %arg2: i32) -> (i32, i32, i32) {
    %c0_i32 = arith.constant 0 : i32
    %c0_i32_0 = arith.constant 0 : i32
    %c0_i32_1 = arith.constant 0 : i32
    %c0_i32_2 = arith.constant 0 : i32
    return %c0_i32, %c0_i32_0, %c0_i32_1 : i32, i32, i32
  }
  func.func @transform_2(%arg0: i32, %arg1: i32, %arg2: i32) -> (i32, i32) {
    %c0_i32 = arith.constant 0 : i32
    %c0_i32_0 = arith.constant 0 : i32
    return %arg0, %c0_i32 : i32, i32
  }
  func.func @transform_3(%arg0: i32, %arg1: i32, %arg2: i32) -> (i32, i32, i32) {
    %c0_i32 = arith.constant 0 : i32
    %c0_i32_0 = arith.constant 0 : i32
    %c0_i32_1 = arith.constant 0 : i32
    return %arg0, %c0_i32, %c0_i32_0 : i32, i32, i32
  }
}

module attributes {stable_mosaic.version = 11 : i64} {
  func.func @_normalize_kernel(%arg0: i32, %arg1: memref<1x128xf32, #tpu.memory_space<vmem>>, %arg2: memref<1x128xf32, #tpu.memory_space<vmem>>, %arg3: memref<32x128xf32, #tpu.memory_space<vmem>>, %arg4: memref<32x128xf32, #tpu.memory_space<vmem>>) attributes {dimension_semantics = [#tpu.dimension_semantics<parallel>], iteration_bounds = array<i64: 2>, scalar_prefetch = 0 : i64, scratch_operands = 0 : i64, tpu.core_type = #tpu.core_type<tc>, window_params = [{pipeline_mode = #tpu.pipeline_mode<synchronous>, transform_indices = @transform_0, window_bounds = array<i64: 1, 128>}, {pipeline_mode = #tpu.pipeline_mode<synchronous>, transform_indices = @transform_1, window_bounds = array<i64: 1, 128>}, {transform_indices = @transform_2, window_bounds = array<i64: 32, 128>}, {transform_indices = @transform_3, window_bounds = array<i64: 32, 128>}]} {
    %c0 = arith.constant 0 : index
    %c0_0 = arith.constant 0 : index
    %0 = vector.load %arg3[%c0, %c0_0] : memref<32x128xf32, #tpu.memory_space<vmem>>, vector<32x128xf32>
    %c0_1 = arith.constant 0 : index
    %c0_2 = arith.constant 0 : index
    %1 = vector.load %arg1[%c0_1, %c0_2] : memref<1x128xf32, #tpu.memory_space<vmem>>, vector<1x128xf32>
    %2 = vector.broadcast %1 : vector<1x128xf32> to vector<32x128xf32>
    %3 = arith.mulf %0, %2 : vector<32x128xf32>
    %c0_3 = arith.constant 0 : index
    %c0_4 = arith.constant 0 : index
    %4 = vector.load %arg2[%c0_3, %c0_4] : memref<1x128xf32, #tpu.memory_space<vmem>>, vector<1x128xf32>
    %5 = vector.broadcast %4 : vector<1x128xf32> to vector<32x128xf32>
    %6 = arith.addf %3, %5 : vector<32x128xf32>
    %c0_5 = arith.constant 0 : index
    %c0_6 = arith.constant 0 : index
    %7 = vector.load %arg4[%c0_5, %c0_6] : memref<32x128xf32, #tpu.memory_space<vmem>>, vector<32x128xf32>
    tpu.vector_store %arg4[%c0_5, %c0_6], %6 {strides = array<i32>} : memref<32x128xf32, #tpu.memory_space<vmem>>, vector<32x128xf32>,
    return
  }
  func.func @transform_0(%arg0: i32) -> (i32, i32) {
    %c0_i32 = arith.constant 0 : i32
    %c0_i32_0 = arith.constant 0 : i32
    %c0_i32_1 = arith.constant 0 : i32
    return %c0_i32, %c0_i32_0 : i32, i32
  }
  func.func @transform_1(%arg0: i32) -> (i32, i32) {
    %c0_i32 = arith.constant 0 : i32
    %c0_i32_0 = arith.constant 0 : i32
    %c0_i32_1 = arith.constant 0 : i32
    return %c0_i32, %c0_i32_0 : i32, i32
  }
  func.func @transform_2(%arg0: i32) -> (i32, i32) {
    %c0_i32 = arith.constant 0 : i32
    %c0_i32_0 = arith.constant 0 : i32
    return %arg0, %c0_i32 : i32, i32
  }
  func.func @transform_3(%arg0: i32) -> (i32, i32) {
    %c0_i32 = arith.constant 0 : i32
    %c0_i32_0 = arith.constant 0 : i32
    return %arg0, %c0_i32 : i32, i32
  }
}

</mosaic_0001>

<bundles_post_ra>
// kernel: truncated_krylov_forward.3
= control target key start
LH: loop header
LB: loop body
LE: loop exit
PB: predicated region body
PF: predicated region fallthrough
CT: control target
= control target key end

     0   :  { %s309_s12 = smov 0   ;;  %s332_s0 = inlined_call_operand.vmem [shape: f32[1,128], index: 0, kind: input, shape index: {}]   ;;  %s333_s1 = inlined_call_operand.vmem [shape: f32[1,128], index: 1, kind: input, shape index: {}]   ;;  %s334_s2 = inlined_call_operand.vmem [shape: f32[64,128], index: 2, kind: input, shape index: {}]   ;;  %s335_s3 = inlined_call_operand.vmem [shape: f32[64,128], index: 3, kind: output, shape index: {}]  }
   0x1 LB: > { %s260_s13 = sadd.s32 4294967295, %s287_s12   ;;  %p264_p0 = scmp.ge.s32.totalorder %s287_s12, 1  ;;  %s287_s12 = sphi %s309_s12, %s13_s12  }
   0x2   : > { %p138_p1 = scmp.lt.s32.totalorder %s287_s12, 3 }
   0x4   : > { %p139_p2 = pnand %p264_p0, %p138_p1 }
   0x5   : > { %s265_s14 = sshll.u32 (!%p139_p2), %s260_s13, 2  ;;  %v269_v0 = vld [vmem:[%s332_s0] ss:$0 sm:$0xff] (!%p139_p2) }
   0x6   : > { %142 = sbr.rel (%p139_p2) target bundleno = 23 (0x17), region = 32  ;;  %p163_p3 = scmp.lt.s32.totalorder (!%p139_p2), %s265_s14, 7  ;;  %v270_v1 = vld [vmem:[%s333_s1] ss:$0 sm:$0xff] (!%p139_p2) }
   0xd   : > { %s337_s14 = smov (!%p163_p3, %s265_s14), 7 }
   0xe   : > { %s266_s15 = sshll.u32 %s337_s14, 3 }
   0xf   : > { %s166_s20 = scalar_lea.vmem %s334_s2, %s266_s15  ;;  %s172_s25 = scalar_lea.vmem %s335_s3, %s266_s15 }
  0x10   : > { %v174_v2 = vld [vmem:[%s166_s20] sm:$0xff]  ;;  %v175_v3 = vld [vmem:[%s166_s20 + $0x8] sm:$0xff]  ;;  %v176_v4 = vld [vmem:[%s166_s20 + $0x10] sm:$0xff] }
  0x11   : > { %v185_v5 = vmul.f32 %v269_v0, %v174_v2  ;;  %v186_v6 = vmul.f32 %v269_v0, %v175_v3  ;;  %v187_v7 = vmul.f32 %v269_v0, %v176_v4  ;;  %v177_v8 = vld [vmem:[%s166_s20 + $0x18] sm:$0xff] }
  0x12   : > { %v188_v9 = vmul.f32 %v269_v0, %v177_v8 }
  0x13   : > { %v196_v10 = vadd.f32 %v270_v1, %v185_v5  ;;  %v197_v11 = vadd.f32 %v270_v1, %v186_v6  ;;  %v198_v12 = vadd.f32 %v270_v1, %v187_v7 }
  0x14   : > { %v199_v13 = vadd.f32 %v270_v1, %v188_v9 }
  0x15   : > { %200 = vst [vmem:[%s172_s25] sm:$0xff] %v196_v10  ;;  %201 = vst [vmem:[%s172_s25 + $0x8] sm:$0xff] %v197_v11 }
  0x16   : > { %202 = vst [vmem:[%s172_s25 + $0x10] sm:$0xff] %v198_v12  ;;  %203 = vst [vmem:[%s172_s25 + $0x18] sm:$0xff] %v199_v13 }
  0x17 PF: > { %s13_s12 = sadd.s32 1, %s287_s12  }
  0x18   : > { %p10_p4 = scmp.ge.s32.totalorder %s13_s12, 4  }
  0x1a   :  { %12 = sbr.rel (!%p10_p4) target bundleno = 1 (0x1), region = 62 }

// kernel: truncated_krylov_forward.2
= control target key start
LH: loop header
LB: loop body
LE: loop exit
PB: predicated region body
PF: predicated region fallthrough
CT: control target
= control target key end

     0   :  { %s647_s12 = smov 0   ;;  %s649_s13 = smov 0   ;;  %s737_s0 = inlined_call_operand.vmem [shape: f32[3,64,64], index: 0, kind: input, shape index: {}]   ;;  %s738_s1 = inlined_call_operand.vmem [shape: bf16[3,64,128], index: 1, kind: input, shape index: {}]   ;;  %s739_s2 = inlined_call_operand.vmem [shape: f32[64,128], index: 2, kind: output, shape index: {0}]   ;;  %s740_s3 = inlined_call_operand.vmem [shape: f32[2,2,128], index: 3, kind: output, shape index: {1}]  }
   0x1   :  { %s651_s14 = smov 0   ;;  %s653_s15 = smov 0  }
   0x2   :  { %s655_s16 = smov 0  }
   0x3 LB: > { %s29_s17 = sadd.s32 1, %s616_s14  ;;  %s33_s18 = sadd.s32 1, %s620_s15  ;;  %s624_s16 = sphi %s655_s16, %s14_s16   ;;  %s620_s15 = sphi %s653_s15, %s744_s15   ;;  %s616_s14 = sphi %s651_s14, %s743_s14   ;;  %s612_s13 = sphi %s649_s13, %s742_s13   ;;  %s608_s12 = sphi %s647_s12, %s741_s12  }
   0x4   : > { %p31_p0 = scmp.ge.s32.totalorder %s29_s17, 3  ;;  %p501_p1 = scmp.ge.s32.totalorder %s624_s16, 1 }
   0x5   : > { %p171_p2 = scmp.lt.s32.totalorder %s624_s16, 7 }
   0x6   : > { %s746_s17 = smov (%p31_p0, %s29_s17), 0  ;;  %s748_s18 = smov (!%p31_p0, %s33_s18), %s620_s15 }
   0x7   : > { %p172_p3 = pnand %p501_p1, %p171_p2  ;;  %p35_p4 = scmp.ge.s32.totalorder %s748_s18, 2 }
   0x8   : > { %s502_s19 = sshll.u32 (!%p172_p3), %s612_s13, 2  ;;  %p207_p5 = scmp.lt.s32.totalorder (!%p172_p3), %s608_s12, 2 }
   0x9   : > { %s750_s18 = smov (%p35_p4, %s748_s18), 0  ;;  %175 = sbr.rel (%p172_p3) target bundleno = 294 (0x126), region = 28 }
   0xa   : > { %p209_p6 = scmp.lt.s32.totalorder (!%p172_p3), %s502_s19, 7  ;;  %p225_p7 = scmp.lt.s32.totalorder (!%p172_p3), %s612_s13, 1 }
   0xb   : > { %p230_p8 = scmp.eq.s32.totalorder (!%p172_p3), %s608_s12, 0 }
  0x10   : > { %s208_s20 = scalar_select %p207_p5, %s608_s12, 2 }
  0x11   : > { %s752_s19 = smov (!%p209_p6, %s502_s19), 7  ;;  %s754_s13 = smov (!%p225_p7, %s612_s13), 1 }
  0x12   : > { %s503_s21 = sshll.u32 %s208_s20, 3  ;;  %s506_s23 = sshll.u32 %s752_s19, 3  ;;  %v626_v0 = vmov (%p230_p8), 0.0  }
  0x13   : > { %s215_s22 = sadd.s32 %s503_s21, %s752_s19  ;;  %s685_s27 = scalar_lea.vmem %s739_s2, %s506_s23 }
  0x14   : > { %s504_s24 = sshll.u32 %s215_s22, 3  ;;  %s507_s4 = sshll.u32 %s754_s13, 1  ;;  %236 = vst [vmem:[%s685_s27] sm:$0xff] (%p230_p8), %v626_v0  ;;  %237 = vst [vmem:[%s685_s27 + $0x8] sm:$0xff] (%p230_p8), %v626_v0 }
  0x15   : > { %s217_s30 = scalar_lea.vmem %s737_s0, %s504_s24  ;;  %s693_s7 = scalar_lea.vmem %s740_s3, %s507_s4  ;;  %238 = vst [vmem:[%s685_s27 + $0x10] sm:$0xff] (%p230_p8), %v626_v0  ;;  %239 = vst [vmem:[%s685_s27 + $0x18] sm:$0xff] (%p230_p8), %v626_v0 }
  0x16   : > { %235 = sbr.rel (!%p230_p8) target bundleno = 29 (0x1d), region = 32 }
  0x1d PF: > { %s521_s8 = sshll.u32 %s608_s12, 5  ;;  %v240_v1 = vld [vmem:[%s217_s30] sm:$0xff]  ;;  %v241_v2 = vld [vmem:[%s217_s30 + $0x8] sm:$0xff]  ;;  %vm286_vm0 = vcmask 523264   ;;  %v242_v8 = vld [vmem:[%s217_s30 + $0x10] sm:$0xff]  ;;  %p350_p9 = scmp.eq.s32.totalorder %s608_s12, 2 }
  0x1e   : > { %s249_s11 = scalar_lea.vmem %s738_s1, %s521_s8  ;;  %v244_v3 = vpack.c.bf16 %v241_v2, %v240_v1  ;;  %v243_v9 = vld [vmem:[%s217_s30 + $0x18] sm:$0xff]  ;;  %v258_v11 = vld [vmem:[%s685_s27] sm:$0xff]  ;;  %v259_v15 = vld [vmem:[%s685_s27 + $0x8] sm:$0xff] }
  0x1f   : > { %v582_v4 = vld [vmem:[%s249_s11] sm:$0xff]   ;;  %v583_v5 = vld [vmem:[%s249_s11 + $0x8] sm:$0xff]   ;;  %v584_v6 = vld [vmem:[%s249_s11 + $0x10] sm:$0xff]   ;;  %v245_v10 = vpack.c.bf16 %v243_v9, %v242_v8 }
  0x20   : > { %537 = vmatprep.mubr.msk.bf16.mxu0 %vm286_vm0, %v244_v3  ;;  %529 = vmatprep.subr.bf16.mxu0 %v582_v4  ;;  %v585_v7 = vld [vmem:[%s249_s11 + $0x18] sm:$0xff]   ;;  %v260_v16 = vld [vmem:[%s685_s27 + $0x10] sm:$0xff] }
  0x21   : > { %530 = vmatpush3.bf16.msra.mxu0 %v582_v4  ;;  %v261_v14 = vld [vmem:[%s685_s27 + $0x18] sm:$0xff] }
  0x22   : > { %531 = vmatprep.subr.bf16.mxu0 %v583_v5 }
  0x25   : > { %532 = vmatpush3.bf16.msra.mxu0 %v583_v5 }
  0x26   : > { %533 = vmatprep.subr.bf16.mxu0 %v584_v6 }
  0x29   : > { %534 = vmatpush3.bf16.msra.mxu0 %v584_v6 }
  0x2a   : > { %535 = vmatprep.subr.bf16.mxu0 %v585_v7 }
  0x2d   : > { %536 = vmatpush3.bf16.msra.mxu0 %v585_v7 }
  0x30   : > { %538 = vmatmul.mubr.msk.bf16.vlgmr.msra.gmra.mrb[0].mxu0 %vm286_vm0, %v245_v10 }
 0x103   : > { %v539_v12 = vpop.f32.mrb[0].mxu0  ;;  %354 = sbr.rel (!%p350_p9) target bundleno = 294 (0x126), region = 36 }
 0x104   : > { %v327_v13 = vpop.f32.mrb[1].mxu0  ;;  %v344_v21 = vadd.f32 %v539_v12, %v260_v16 }
 0x105   : > { %v342_v17 = vadd.f32 %v327_v13, %v258_v11  ;;  %v540_v18 = vpop.f32.mrb[2].mxu0 }
 0x106   : > { %v330_v19 = vpop.f32.mrb[3].mxu0  ;;  %v345_v22 = vadd.f32 %v540_v18, %v261_v14  ;;  %348 = vst [vmem:[%s685_s27 + $0x10] sm:$0xff] %v344_v21 }
 0x107   : > { %v343_v20 = vadd.f32 %v330_v19, %v259_v15  ;;  %346 = vst [vmem:[%s685_s27] sm:$0xff] %v342_v17 }
 0x108   : > { %349 = vst [vmem:[%s685_s27 + $0x18] sm:$0xff] %v345_v22 }
 0x109   : > { %347 = vst [vmem:[%s685_s27 + $0x8] sm:$0xff] %v343_v20 }
 0x10d   : > { %v357_v25 = vld [vmem:[%s685_s27 + $0x10] sm:$0xff] }
 0x10e   : > { %v355_v23 = vld [vmem:[%s685_s27] sm:$0xff]  ;;  %v371_v30 = vmul.f32 %v357_v25, %v357_v25 }
 0x10f   : > { %v358_v26 = vld [vmem:[%s685_s27 + $0x18] sm:$0xff]  ;;  %v369_v28 = vmul.f32 %v355_v23, %v355_v23 }
 0x110   : > { %v356_v24 = vld [vmem:[%s685_s27 + $0x8] sm:$0xff]  ;;  %v372_v32 = vmul.f32 %v358_v26, %v358_v26 }
 0x111   : > { %v359_v27 = vadd.f32 %v356_v24, %v355_v23  ;;  %v370_v29 = vmul.f32 %v356_v24, %v356_v24 }
 0x113   : > { %v360_v31 = vadd.f32 %v359_v27, %v357_v25  ;;  %v373_v33 = vadd.f32 %v370_v29, %v369_v28 }
 0x115   : > { %v361_v34 = vadd.f32 %v360_v31, %v358_v26  ;;  %v374_v35 = vadd.f32 %v373_v33, %v371_v30 }
 0x117   : > { %v362_v36 = vrot.slane %v361_v34, 4  ;;  %v375_v37 = vadd.f32 %v374_v35, %v372_v32 }
 0x119   : > { %v363_v38 = vadd.f32 %v362_v36, %v361_v34  ;;  %v376_v39 = vrot.slane %v375_v37, 4 }
 0x11b   : > { %v364_v40 = vrot.slane %v363_v38, 2  ;;  %v377_v41 = vadd.f32 %v376_v39, %v375_v37 }
 0x11d   : > { %v365_v42 = vadd.f32 %v364_v40, %v363_v38  ;;  %v378_v43 = vrot.slane %v377_v41, 2 }
 0x11f   : > { %v366_v44 = vrot.slane %v365_v42, 1  ;;  %v379_v45 = vadd.f32 %v378_v43, %v377_v41 }
 0x121   : > { %v367_v46 = vadd.f32 %v366_v44, %v365_v42  ;;  %v380_v47 = vrot.slane %v379_v45, 1 }
 0x123   : > { %368 = vst [vmem:[%s693_s7] sm:$0x1] %v367_v46  ;;  %v381_v48 = vadd.f32 %v380_v47, %v379_v45 }
 0x125   : > { %382 = vst [vmem:[%s693_s7 + $0x1] sm:$0x1] %v381_v48 }
 0x126 PF: > { %s14_s16 = sadd.s32 1, %s624_s16   ;;  %s741_s12 = smov %s616_s14 }
 0x127   : > { %p11_p10 = scmp.ge.s32.totalorder %s14_s16, 8   ;;  %s742_s13 = smov %s620_s15 }
 0x128   : > { %s743_s14 = smov %s746_s17  ;;  %s744_s15 = smov %s750_s18 }
 0x129   :  { %13 = sbr.rel (!%p11_p10) target bundleno = 3 (0x3), region = 79 }

</bundles_post_ra>
